<compile_context>
chip_gen: v7x
topology: tpu7x:2x2x1
jax: 0.10.0
libtpu: 0.0.40
codegen_flags: <defaults>
</compile_context>

<pallas_src>
import jax
import jax.numpy as jnp
from jax.experimental import pallas as pl
from jax.experimental.pallas import tpu as pltpu


# -----------------------------------------------------------------------------
# Resampling helpers (plain JAX, PyTorch-compatible conventions).
# TODO(synk): gather-based bilinear/nearest resampling has no clean rectangular
# BlockSpec expression, so it is done outside the Pallas kernel.
# -----------------------------------------------------------------------------
def _linear_resize_matrix(in_size: int, out_size: int):
    """1-D bilinear resampling matrix (out, in), align_corners=False."""
    if in_size == out_size:
        return jnp.eye(in_size, dtype=jnp.float32)
    o = jnp.arange(out_size, dtype=jnp.float32)
    src = (o + 0.5) * (in_size / out_size) - 0.5
    src = jnp.clip(src, 0.0, float(in_size - 1))
    i0 = jnp.clip(jnp.floor(src).astype(jnp.int32), 0, in_size - 1)
    i1 = jnp.clip(i0 + 1, 0, in_size - 1)
    w1 = src - i0.astype(jnp.float32)
    w0 = 1.0 - w1
    rows = jnp.arange(out_size)
    m = jnp.zeros((out_size, in_size), jnp.float32)
    m = m.at[rows, i0].add(w0)
    m = m.at[rows, i1].add(w1)
    return m


def _bilinear_resize_nchw(x, out_h, out_w):
    _, _, in_h, in_w = x.shape
    rh = _linear_resize_matrix(in_h, out_h)   # (out_h, in_h)
    rw = _linear_resize_matrix(in_w, out_w)   # (out_w, in_w)
    return jnp.einsum("hH,bcHW,wW->bchw", rh, x.astype(jnp.float32), rw)


def _nearest_resize_nchw(x, out_h, out_w):
    _, _, in_h, in_w = x.shape
    ih = jnp.clip(jnp.floor(jnp.arange(out_h, dtype=jnp.float32)
                            * (in_h / out_h)).astype(jnp.int32), 0, in_h - 1)
    iw = jnp.clip(jnp.floor(jnp.arange(out_w, dtype=jnp.float32)
                            * (in_w / out_w)).astype(jnp.int32), 0, in_w - 1)
    return x[:, :, ih[:, None], iw[None, :]]


# -----------------------------------------------------------------------------
# Pallas kernel: out = color + relu(W @ (depth * mask) + b), all float32.
# -----------------------------------------------------------------------------
def _inject_kernel(depth_ref, mask_ref, color_ref, w_ref, b_ref, o_ref):
    # depth_ref: (1, D, tn)  mask_ref: (1, 1, tn)  color_ref: (1, tc, tn)
    # w_ref:     (tc, D)     b_ref:    (tc, 1)     o_ref:     (1, tc, tn)
    # D is tiny (e.g. 3): the 1x1 conv is D unrolled VPU multiply-adds instead
    # of an MXU matmul (kernel is HBM-bound; the VPU has huge slack), keeping
    # exact f32 semantics.
    gated = depth_ref[0] * mask_ref[0]                       # (D, tn)
    w = w_ref[...]                                           # (tc, D)
    acc = w[:, 0:1] * gated[0:1, :]                          # (tc, tn) f32
    for k in range(1, gated.shape[0]):
        acc = acc + w[:, k:k + 1] * gated[k:k + 1, :]
    enh = jnp.maximum(acc + b_ref[...], 0.0)                 # bias + ReLU
    o_ref[0] = (color_ref[0] + enh).astype(o_ref.dtype)


# -----------------------------------------------------------------------------
# Tiling helpers.
# -----------------------------------------------------------------------------
def _pick_row_tile(c: int, cap: int = 256) -> int:
    """Largest multiple-of-8 divisor of c that is <= cap (else the full axis)."""
    if c <= cap:
        return c
    for t in range(cap, 7, -8):
        if c % t == 0:
            return t
    return c


def _pick_lane_tile(hw: int, cap: int) -> int:
    """Full axis if it fits; else the largest multiple-of-128 divisor of hw that
    fits the cap (keeps stores unmasked); else a ragged multiple-of-128 cap."""
    if hw <= cap:
        return hw
    t = (cap // 128) * 128
    while t >= 128:
        if hw % t == 0:
            return t
        t -= 128
    return max(128, (cap // 128) * 128)


def _vmem_capacity_bytes() -> int:
    try:
        return int(pltpu.get_tpu_info().vmem_capacity_bytes)
    except Exception:  # conservative fallback (v5e/v6e value)
        return 128 * 1024 * 1024


def depth_inject_scale(color, depth_ds, mask_ds, weight, bias):
    """fused = color + relu(conv1x1(depth_ds * mask_ds)); all tensors NCHW f32.

    color   : (B, C, H, W) float32
    depth_ds: (B, D, H, W) depth gradient map already resized to (H, W)
    mask_ds : (B, 1, H, W) gradient mask already resized to (H, W)
    weight  : (C, D)       1x1 conv kernel (spatial dims squeezed)
    bias    : (C,)
    """
    b, c, h, w = color.shape
    _, d, _, _ = depth_ds.shape
    assert mask_ds.shape == (b, 1, h, w)
    assert weight.shape == (c, d) and bias.shape == (c,)
    hw = h * w

    if hw < 128:
        # Tiny pyramid levels: vregs would be <50% lane-occupied and per-kernel
        # launch overhead dominates -> identical math in plain JAX.
        gated = depth_ds * mask_ds
        enh = jnp.einsum("od,bdhw->bohw", weight, gated,
                         precision=jax.lax.Precision.HIGHEST)
        return color + jnp.maximum(enh + bias[None, :, None, None], 0.0)

    # NCHW -> (B, C, H*W): pure reshapes (no transposes); H*W is lane-dense.
    color_f = color.reshape(b, c, hw)
    depth_f = depth_ds.reshape(b, d, hw)
    mask_f = mask_ds.reshape(b, 1, hw)
    w_k = weight                                  # (C, D) float32
    b_k = bias.reshape(c, 1)                      # (C, 1) float32

    # Channel tile.
    tc = _pick_row_tile(c)

    # Generation-aware lane tile: double-buffered tile budget ~24 MiB on v7x
    # (64 MiB VMEM per TensorCore), ~48 MiB on v5e/v6e (128 MiB VMEM).
    vmem_cap = _vmem_capacity_bytes()
    small_vmem = vmem_cap <= 64 * 1024 * 1024
    tile_budget = (24 if small_vmem else 48) * 1024 * 1024
    per_lane_bytes = 2 * 4 * (2 * tc + d + 1)     # 2 bufs * f32 * (color in+out, depth, mask)
    tn = _pick_lane_tile(hw, max(128, tile_budget // per_lane_bytes))

    # v7x shards "parallel" grid axes across its 2 TensorCores; guarantee >=2
    # grid points so neither core idles (cheap no-op on 1-TC chips).
    if b * (c // tc) * pl.cdiv(hw, tn) < 2:
        if tc % 16 == 0:
            tc //= 2
        elif tn % 256 == 0:
            tn //= 2

    # Channel-tile axis innermost: the depth/mask block indices do not change
    # between consecutive steps, so Pallas skips their re-DMA across channel
    # tiles (matters when C > 256).
    grid = (b, pl.cdiv(hw, tn), c // tc)
    vmem_limit = (48 if small_vmem else 64) * 1024 * 1024

    out = pl.pallas_call(
        _inject_kernel,
        out_shape=jax.ShapeDtypeStruct((b, c, hw), color.dtype),
        grid_spec=pltpu.PrefetchScalarGridSpec(
            num_scalar_prefetch=0,
            grid=grid,
            in_specs=[
                pl.BlockSpec((1, d, tn), lambda bi, j, ci: (bi, 0, j)),
                pl.BlockSpec((1, 1, tn), lambda bi, j, ci: (bi, 0, j)),
                pl.BlockSpec((1, tc, tn), lambda bi, j, ci: (bi, ci, j)),
                pl.BlockSpec((tc, d), lambda bi, j, ci: (ci, 0)),
                pl.BlockSpec((tc, 1), lambda bi, j, ci: (ci, 0)),
            ],
            out_specs=pl.BlockSpec((1, tc, tn), lambda bi, j, ci: (bi, ci, j)),
        ),
        compiler_params=pltpu.CompilerParams(
            dimension_semantics=("parallel", "parallel", "parallel"),
            vmem_limit_bytes=vmem_limit,
        ),
    )(depth_f, mask_f, color_f, w_k, b_k)

    return out.reshape(b, c, h, w)


class DepthGradientInjectionResidual:
    """JAX/Pallas port of the PyTorch DepthGradientInjectionResidual module."""

    def __init__(self, color_channels, depth_gradient_channels, key):
        self.color_channels = list(color_channels)
        self.depth_gradient_channels = depth_gradient_channels
        self.num_scales = len(self.color_channels)
        self.weights, self.biases = [], []
        bound = 1.0 / (depth_gradient_channels ** 0.5)
        for c in self.color_channels:
            kw, kb, key = jax.random.split(key, 3)
            self.weights.append(jax.random.uniform(
                kw, (c, depth_gradient_channels), jnp.float32, -bound, bound))
            self.biases.append(jax.random.uniform(
                kb, (c,), jnp.float32, -bound, bound))

    def __call__(self, color_feature_maps, processed_depth_gradient_map,
                 gradient_mask):
        assert len(color_feature_maps) == self.num_scales, (
            f"Expected {self.num_scales} color feature maps, "
            f"got {len(color_feature_maps)}")
        fused = []
        for i, color_feat in enumerate(color_feature_maps):
            if processed_depth_gradient_map is None or gradient_mask is None:
                fused.append(color_feat)
                continue
            assert processed_depth_gradient_map.shape[1] == self.depth_gradient_channels
            assert gradient_mask.shape[1] == 1
            _, _, hi, wi = color_feat.shape
            depth_ds = _bilinear_resize_nchw(processed_depth_gradient_map, hi, wi)
            mask_ds = _nearest_resize_nchw(gradient_mask, hi, wi)
            fused.append(depth_inject_scale(
                color_feat, depth_ds, mask_ds, self.weights[i], self.biases[i]))
        return fused


def _reference(color_maps, depth_map, mask, weights, biases):
    """Pure-JAX f32 reference: resize -> gate -> 1x1 conv -> ReLU -> residual."""
    outs = []
    for color, w, b in zip(color_maps, weights, biases):
        _, _, hi, wi = color.shape
        dd = _bilinear_resize_nchw(depth_map, hi, wi)
        mm = _nearest_resize_nchw(mask, hi, wi)
        gated = dd * mm
        enh = jnp.einsum("od,bdhw->bohw", w, gated,
                         precision=jax.lax.Precision.HIGHEST)
        enh = enh + b[None, :, None, None]
        outs.append(color + jnp.maximum(enh, 0.0))
    return outs


if __name__ == "__main__":
    key = jax.random.PRNGKey(0)
    k_model, k_data = jax.random.split(key)

    color_channels = [32, 64, 128, 256]
    depth_gradient_channels = 3
    batch = 2
    full_res = (64, 64)
    scale_res = [(32, 32), (16, 16), (8, 8), (4, 4)]

    model = DepthGradientInjectionResidual(color_channels,
                                           depth_gradient_channels, k_model)

    color_maps = []
    for (hi, wi), c in zip(scale_res, color_channels):
        k_data, kc = jax.random.split(k_data)
        color_maps.append(jax.random.normal(kc, (batch, c, hi, wi), jnp.float32))
    k_data, kd, km = jax.random.split(k_data, 3)
    depth_grad = jax.random.normal(
        kd, (batch, depth_gradient_channels) + full_res, jnp.float32)
    grad_mask = (jax.random.uniform(km, (batch, 1) + full_res)
                 > 0.3).astype(jnp.float32)

    fused = model(color_maps, depth_grad, grad_mask)
    fused = [jax.block_until_ready(f) for f in fused]

    # Kernel math is full f32 (matches PyTorch module semantics) -> tight check.
    refs = _reference(color_maps, depth_grad, grad_mask,
                      model.weights, model.biases)
    for got, want in zip(fused, refs):
        assert got.shape == want.shape, (got.shape, want.shape)
        assert jnp.allclose(got, want, atol=1e-4, rtol=1e-4), (
            float(jnp.max(jnp.abs(got - want))))

    print("KERNEL_OK")
</pallas_src>

<mosaic_0001>
module attributes {stable_mosaic.version = 11 : i64} {
  func.func @_inject_kernel(%arg0: i32, %arg1: i32, %arg2: i32, %arg3: memref<1x3x1024xf32, #tpu.memory_space<vmem>>, %arg4: memref<1x1x1024xf32, #tpu.memory_space<vmem>>, %arg5: memref<1x32x1024xf32, #tpu.memory_space<vmem>>, %arg6: memref<32x3xf32, #tpu.memory_space<vmem>>, %arg7: memref<32x1xf32, #tpu.memory_space<vmem>>, %arg8: memref<1x32x1024xf32, #tpu.memory_space<vmem>>) attributes {dimension_semantics = [#tpu.dimension_semantics<parallel>, #tpu.dimension_semantics<parallel>, #tpu.dimension_semantics<parallel>], iteration_bounds = array<i64: 2, 1, 1>, scalar_prefetch = 0 : i64, scratch_operands = 0 : i64, tpu.core_type = #tpu.core_type<tc>, window_params = [{transform_indices = @transform_0, window_bounds = array<i64: 1, 3, 1024>}, {transform_indices = @transform_1, window_bounds = array<i64: 1, 1, 1024>}, {transform_indices = @transform_2, window_bounds = array<i64: 1, 32, 1024>}, {transform_indices = @transform_3, window_bounds = array<i64: 32, 3>}, {transform_indices = @transform_4, window_bounds = array<i64: 32, 1>}, {transform_indices = @transform_5, window_bounds = array<i64: 1, 32, 1024>}]} {
    %c0 = arith.constant 0 : index
    %c0_0 = arith.constant 0 : index
    %c0_1 = arith.constant 0 : index
    %0 = vector.load %arg3[%c0, %c0_0, %c0_1] : memref<1x3x1024xf32, #tpu.memory_space<vmem>>, vector<1x3x1024xf32>
    %1 = vector.shape_cast %0 : vector<1x3x1024xf32> to vector<3x1024xf32>
    %c0_2 = arith.constant 0 : index
    %c0_3 = arith.constant 0 : index
    %c0_4 = arith.constant 0 : index
    %2 = vector.load %arg4[%c0_2, %c0_3, %c0_4] : memref<1x1x1024xf32, #tpu.memory_space<vmem>>, vector<1x1x1024xf32>
    %3 = vector.shape_cast %2 : vector<1x1x1024xf32> to vector<1x1024xf32>
    %4 = vector.broadcast %3 : vector<1x1024xf32> to vector<3x1024xf32>
    %5 = arith.mulf %1, %4 : vector<3x1024xf32>
    %c0_5 = arith.constant 0 : index
    %c0_6 = arith.constant 0 : index
    %6 = vector.load %arg6[%c0_5, %c0_6] : memref<32x3xf32, #tpu.memory_space<vmem>>, vector<32x3xf32>
    %7 = vector.extract_strided_slice %6 {offsets = [0, 0], sizes = [32, 1], strides = [1, 1]} : vector<32x3xf32> to vector<32x1xf32>
    %8 = vector.extract_strided_slice %5 {offsets = [0, 0], sizes = [1, 1024], strides = [1, 1]} : vector<3x1024xf32> to vector<1x1024xf32>
    %9 = vector.broadcast %7 : vector<32x1xf32> to vector<32x1024xf32>
    %10 = vector.broadcast %8 : vector<1x1024xf32> to vector<32x1024xf32>
    %11 = arith.mulf %9, %10 : vector<32x1024xf32>
    %12 = vector.extract_strided_slice %6 {offsets = [0, 1], sizes = [32, 1], strides = [1, 1]} : vector<32x3xf32> to vector<32x1xf32>
    %13 = vector.extract_strided_slice %5 {offsets = [1, 0], sizes = [1, 1024], strides = [1, 1]} : vector<3x1024xf32> to vector<1x1024xf32>
    %14 = vector.broadcast %12 : vector<32x1xf32> to vector<32x1024xf32>
    %15 = vector.broadcast %13 : vector<1x1024xf32> to vector<32x1024xf32>
    %16 = arith.mulf %14, %15 : vector<32x1024xf32>
    %17 = arith.addf %11, %16 : vector<32x1024xf32>
    %18 = vector.extract_strided_slice %6 {offsets = [0, 2], sizes = [32, 1], strides = [1, 1]} : vector<32x3xf32> to vector<32x1xf32>
    %19 = vector.extract_strided_slice %5 {offsets = [2, 0], sizes = [1, 1024], strides = [1, 1]} : vector<3x1024xf32> to vector<1x1024xf32>
    %20 = vector.broadcast %18 : vector<32x1xf32> to vector<32x1024xf32>
    %21 = vector.broadcast %19 : vector<1x1024xf32> to vector<32x1024xf32>
    %22 = arith.mulf %20, %21 : vector<32x1024xf32>
    %23 = arith.addf %17, %22 : vector<32x1024xf32>
    %c0_7 = arith.constant 0 : index
    %c0_8 = arith.constant 0 : index
    %24 = vector.load %arg7[%c0_7, %c0_8] : memref<32x1xf32, #tpu.memory_space<vmem>>, vector<32x1xf32>
    %25 = vector.broadcast %24 : vector<32x1xf32> to vector<32x1024xf32>
    %26 = arith.addf %23, %25 : vector<32x1024xf32>
    %cst = arith.constant 0.000000e+00 : f32
    %27 = vector.broadcast %cst : f32 to vector<32x1024xf32>
    %28 = arith.maximumf %26, %27 : vector<32x1024xf32>
    %c0_9 = arith.constant 0 : index
    %c0_10 = arith.constant 0 : index
    %c0_11 = arith.constant 0 : index
    %29 = vector.load %arg5[%c0_9, %c0_10, %c0_11] : memref<1x32x1024xf32, #tpu.memory_space<vmem>>, vector<1x32x1024xf32>
    %30 = vector.shape_cast %29 : vector<1x32x1024xf32> to vector<32x1024xf32>
    %31 = arith.addf %30, %28 : vector<32x1024xf32>
    %c0_12 = arith.constant 0 : index
    %c0_13 = arith.constant 0 : index
    %c0_14 = arith.constant 0 : index
    %32 = vector.load %arg8[%c0_12, %c0_13, %c0_14] : memref<1x32x1024xf32, #tpu.memory_space<vmem>>, vector<1x32x1024xf32>
    %33 = vector.shape_cast %32 : vector<1x32x1024xf32> to vector<32x1024xf32>
    %34 = vector.shape_cast %31 : vector<32x1024xf32> to vector<1x32x1024xf32>
    tpu.vector_store %arg8[%c0_12, %c0_13, %c0_14], %34 {strides = array<i32>} : memref<1x32x1024xf32, #tpu.memory_space<vmem>>, vector<1x32x1024xf32>,
    return
  }
  func.func @transform_0(%arg0: i32, %arg1: i32, %arg2: i32) -> (i32, i32, i32) {
    %c0_i32 = arith.constant 0 : i32
    %c0_i32_0 = arith.constant 0 : i32
    return %arg0, %c0_i32, %arg1 : i32, i32, i32
  }
  func.func @transform_1(%arg0: i32, %arg1: i32, %arg2: i32) -> (i32, i32, i32) {
    %c0_i32 = arith.constant 0 : i32
    %c0_i32_0 = arith.constant 0 : i32
    return %arg0, %c0_i32, %arg1 : i32, i32, i32
  }
  func.func @transform_2(%arg0: i32, %arg1: i32, %arg2: i32) -> (i32, i32, i32) {
    %c0_i32 = arith.constant 0 : i32
    return %arg0, %arg2, %arg1 : i32, i32, i32
  }
  func.func @transform_3(%arg0: i32, %arg1: i32, %arg2: i32) -> (i32, i32) {
    %c0_i32 = arith.constant 0 : i32
    %c0_i32_0 = arith.constant 0 : i32
    return %arg2, %c0_i32 : i32, i32
  }
  func.func @transform_4(%arg0: i32, %arg1: i32, %arg2: i32) -> (i32, i32) {
    %c0_i32 = arith.constant 0 : i32
    %c0_i32_0 = arith.constant 0 : i32
    return %arg2, %c0_i32 : i32, i32
  }
  func.func @transform_5(%arg0: i32, %arg1: i32, %arg2: i32) -> (i32, i32, i32) {
    %c0_i32 = arith.constant 0 : i32
    return %arg0, %arg2, %arg1 : i32, i32, i32
  }
}

</mosaic_0001>

<bundles_post_ra>
// kernel: tpu_custom_call.1
= control target key start
LH: loop header
LB: loop body
LE: loop exit
PB: predicated region body
PF: predicated region fallthrough
CT: control target
= control target key end

     0   :  { %s2435_s0 = inlined_call_operand.hbm [shape: f32[2,3,1024], index: 0, kind: input, shape index: {}]   ;;  %s2436_s1 = inlined_call_operand.hbm [shape: f32[2,1,1024], index: 1, kind: input, shape index: {}]   ;;  %s2437_s2 = inlined_call_operand.hbm [shape: f32[2,32,1024], index: 2, kind: input, shape index: {}]   ;;  %s2438_s3 = inlined_call_operand.hbm [shape: f32[32,3], index: 3, kind: input, shape index: {}]   ;;  %s2439_s4 = inlined_call_operand.hbm [shape: f32[32,1], index: 4, kind: input, shape index: {}]   ;;  %s2440_s5 = inlined_call_operand.hbm [shape: f32[2,32,1024], index: 5, kind: output, shape index: {}]  }
   0x1   :  { %2458 = sst [smem:[#allocation44_spill]] %s2436_s1 }
   0x2   :  { %2459 = sst [smem:[#allocation45_spill]] %s2438_s3 }
   0x3   :  { %10 = vsyncpa [#allocation3], 0 }
   0x4   :  { %12 = vsyncpa [#allocation3 + $0x1], 0 }
   0x5   :  { %13 = vsyncpa [#allocation6], 0 }
   0x6   :  { %15 = vsyncpa [#allocation6 + $0x1], 0 }
   0x7   :  { %16 = vsyncpa [#allocation9], 0 }
   0x8   :  { %17 = vsyncpa [#allocation4], 0 }
   0x9   :  { %19 = vsyncpa [#allocation4 + $0x1], 0  ;;  %s1687_s18 = smov 0   ;;  %s1689_s19 = smov 0  }
   0xa   :  { %s1691_s20 = smov 0   ;;  %s1693_s21 = smov 0  }
   0xb   :  { %s1695_s22 = smov 0   ;;  %s1697_s23 = smov 0  }
   0xc LB: > { %2460 = sst [smem:[#allocation16_spill]] %s1628_s20  ;;  %s1718_s24 = sadd.s32 4294967295, %s1640_s23   ;;  %s1640_s23 = sphi %s1697_s23, %s25_s23   ;;  %s1636_s22 = sphi %s1695_s22, %s2544_s22   ;;  %s1632_s21 = sphi %s1693_s21, %s2543_s21   ;;  %s1628_s20 = sphi %s1691_s20, %s2539_s20   ;;  %s1624_s19 = sphi %s1689_s19, %s2542_s19   ;;  %s1620_s18 = sphi %s1687_s18, %s2541_s18  }
   0xd   : > { %2461 = sst [smem:[#allocation17_spill]] %s1640_s23  ;;  %s1265_s25 = sadd.s32 4294967294, %s1640_s23  }
   0xe   : > { %p66_p0 = scmp.ne.s32.totalorder %s1624_s19, %s1620_s18  ;;  %p2441_p1 = scmp.eq.s32.totalorder %s1718_s24, 0 }
   0xf   : > { %p210_p3 = scmp.eq.s32.totalorder %s1265_s25, 1  ;;  %p1266_p5 = scmp.ge.s32.totalorder %s1640_s23, 1 }
  0x10   : > { %p1727_p4 = por %p2441_p1, %p66_p0  ;;  %p217_p7 = scmp.lt.s32.totalorder %s1640_s23, 3 }
  0x11   : > { %p1732_p6 = por %p210_p3, %p66_p0  ;;  %s1642_s29 = smov [#allocation8]  }
  0x12   : > { %s2462_s26 = scalar_select %p1727_p4, 1, 0 }
  0x13   : > { %s2463_s27 = scalar_select %p1732_p6, 1, 0 }
  0x14   : > { %p1737_p8 = pnand %p1266_p5, %p217_p7  ;;  %s232_s30 = sshll.u32 %s1642_s29, 4  ;;  %s233_s30 = int_to_ptr.vmem [resolvable:$true] %s232_s30 }
  0x15   : > { %s44_s7 = sadd.s32 1, %s1636_s22  ;;  %s2466_s3 = sld [smem:[#allocation45_spill]] }
  0x16   : > { %s2464_s28 = scalar_select %p1737_p8, 1, 0 }
  0x17   : > { %p1311_p9 = pneg %p1737_p8 }
  0x19   : > { %p1746_p11 = pnand %p1311_p9, %p2441_p1 }
  0x1b   : > { %s2465_s6 = scalar_select %p1746_p11, 1, 0 }
  0x1c   : > { %s1404_s10 = scalar_lea.hbm %s2466_s3, 512  ;;  %p2447_p13 = pneg %p1746_p11 }
  0x1d   : > { %p1405_p12 = scmp.ne.s32.totalorder %s2466_s3, %s1404_s10  ;;  %p1411_p5 = scmp.lt.u32.totalorder %s1404_s10, %s2466_s3 }
  0x1f   : > { %p1407_p0 = pnand %p2447_p13, %p1405_p12 }
  0x21   : > { %p1408_p3 = pneg %p1407_p0 }
  0x23   : > { %p1413_p7 = pnand %p1411_p5, %p1408_p3 }
  0x25   : > { %1416 = shalt.err (!%p1413_p7)
}
  0x26   : > { %s1417_s15 = scalar_lea.vmem %s233_s30, 512  ;;  %p1425_p2 = scmp.lt.s32.totalorder %s233_s30, %s233_s30 }
  0x27   : > { %p1418_p9 = scmp.ne.s32.totalorder %s233_s30, %s1417_s15  ;;  %p1426_p6 = scmp.lt.s32.totalorder %s1417_s15, %s1417_s15 }
  0x29   : > { %p1420_p10 = pnand %p1418_p9, %p2447_p13  ;;  %p1427_p4 = por %p1426_p6, %p1425_p2 }
  0x2b   : > { %p1421_p1 = pneg %p1420_p10 }
  0x2d   : > { %p1428_p8 = pnand %p1427_p4, %p1421_p1 }
  0x2f   : > { %1431 = shalt.err (!%p1428_p8)
}
  0x30   : > { %s2444_s16 = smov 128   ;;  %s2445_s17 = smov 8  }
  0x31   : > { %1314 = dma.hbm_to_vmem [thread:$0]  (!%p1746_p11), %s2466_s3, 512, %s233_s30, [#allocation9], %s2444_s16, %s2444_s16, %s2445_s17  }
  0x32   : > { %p46_p1 = scmp.ge.s32.totalorder %s44_s7, 2  ;;  %s53_s8 = sadd.s32 1, %s1628_s20 }
  0x33   : > { %p60_p2 = scmp.ne.s32.totalorder %s1628_s20, %s1624_s19  ;;  %p61_p4 = scmp.eq.s32.totalorder %s1640_s23, 0 }
  0x34   : > { %s2546_s7 = smov (%p46_p1, %s44_s7), 0  ;;  %p2468_p8 = scmp.eq.s32.totalorder %s1718_s24, 1 }
  0x35   : > { %2467 = sst [smem:[#allocation18_spill]] %s2546_s7  ;;  %p62_p6 = por %p61_p4, %p60_p2 }
  0x36   : > { %p1784_p10 = por %p2468_p8, %p60_p2  ;;  %s48_s10 = ssub.s32 %s1636_s22, %s2546_s7 }
  0x37   : > { %p1334_p12 = scmp.lt.s32.totalorder %s1640_s23, 2  ;;  %p51_p0 = scmp.eq.s32.totalorder %s48_s10, 0 }
  0x38   : > { %s2469_s9 = scalar_select %p1784_p10, 1, 0 }
  0x39   : > { %s1792_s11 = sand.u32 1, %s1628_s20   ;;  %p1794_p3 = pnand %p1334_p12, %p62_p6 }
  0x3a   : > { %s283_s12 = sand.u32 1, %s1640_s23   ;;  %s1273_s14 = sshll.u32 %s1792_s11, 3 }
  0x3b   : > { %s2470_s30 = scalar_select %p1794_p3, 1, 0 }
  0x3c   : > { %s1800_s13 = scalar_select %p51_p0, %s1628_s20, %s53_s8  }
  0x3d   : > { %s1292_s15 = sshll.u32 %s1636_s22, 7  ;;  %s2472_s1 = sld [smem:[#allocation44_spill]] }
  0x3e   : > { %2471 = sst [smem:[#allocation19_spill]] %s1800_s13  ;;  %s287_s10 = scalar_lea.vmem [#allocation5], %s1273_s14 }
  0x3f   : > { %s297_s17 = sshll.u32 %s287_s10, 4  ;;  %s1812_s7 = scalar_lea.sflag [#allocation6], %s283_s12  ;;  %s1810_s17 = int_to_ptr.vmem [resolvable:$true] %s297_s17 }
  0x40   : > { %p1818_p7 = pneg %p1794_p3 }
  0x42   : > { %s2473_s13 = scalar_select %p1818_p7, 1, 0 }
  0x43   : > { %s1807_s16 = scalar_lea.hbm %s2472_s1, %s1292_s15  ;;  %s1437_s14 = scalar_lea.hbm %s2472_s1, 256 }
  0x44   : > { %s1432_s8 = scalar_lea.hbm %s1807_s16, 128  ;;  %p1438_p2 = scmp.lt.u32.totalorder %s1807_s16, %s2472_s1 }
  0x45   : > { %p1433_p5 = scmp.ne.s32.totalorder %s1807_s16, %s1432_s8  ;;  %p1439_p4 = scmp.lt.u32.totalorder %s1437_s14, %s1432_s8 }
  0x46   : > { %p1441_p8 = scmp.lt.u32.totalorder %s1432_s8, %s1807_s16 }
  0x47   : > { %p1435_p9 = pnand %p1818_p7, %p1433_p5  ;;  %p1440_p6 = por %p1439_p4, %p1438_p2 }
  0x49   : > { %p1436_p1 = pneg %p1435_p9  ;;  %p1442_p12 = por %p1441_p8, %p1440_p6 }
  0x4b   : > { %p1443_p0 = pnand %p1442_p12, %p1436_p1 }
  0x4d   : > { %1446 = shalt.err (!%p1443_p0)
}
  0x4e   : > { %s1447_s12 = scalar_lea.vmem %s1810_s17, 128  ;;  %s1645_s15 = smov [#allocation5]  }
  0x4f   : > { %p1448_p5 = scmp.ne.s32.totalorder %s1810_s17, %s1447_s12  ;;  %s1452_s25 = sshll.u32 %s1645_s15, 4  ;;  %s1453_s25 = int_to_ptr.vmem [resolvable:$false] %s1452_s25 }
  0x50   : > { %s1454_s29 = scalar_lea.vmem %s1453_s25, 256  ;;  %p1455_p10 = scmp.lt.s32.totalorder %s1810_s17, %s1453_s25 }
  0x51   : > { %p1450_p9 = pnand %p1448_p5, %p1818_p7  ;;  %p1456_p11 = scmp.lt.s32.totalorder %s1454_s29, %s1447_s12 }
  0x53   : > { %p1451_p13 = pneg %p1450_p9  ;;  %p1457_p2 = por %p1456_p11, %p1455_p10 }
  0x55   : > { %p1458_p4 = pnand %p1457_p2, %p1451_p13 }
  0x57   : > { %1461 = shalt.err (!%p1458_p4)
}
  0x58   : > { %1324 = dma.hbm_to_vmem [thread:$0]  (!%p1794_p3), %s1807_s16, 128, %s1810_s17, %s1812_s7  }
  0x59   : > { %s1646_s8 = smov [#allocation10]   ;;  %s1270_s10 = sshll.u32 %s1792_s11, 5 }
  0x5a   : > { %s248_s14 = sshll.u32 %s1646_s8, 4  ;;  %s1462_s25 = scalar_lea.hbm %s2439_s4, 512  ;;  %s249_s14 = int_to_ptr.vmem [resolvable:$true] %s248_s14 }
  0x5b   : > { %p1463_p11 = scmp.ne.s32.totalorder %s2439_s4, %s1462_s25  ;;  %p2474_p13 = scmp.ne.s32.totalorder %s2465_s6, 0 }
  0x5c   : > { %p1469_p8 = scmp.lt.u32.totalorder %s1462_s25, %s2439_s4 }
  0x5d   : > { %p2475_p10 = pneg %p2474_p13 }
  0x5f   : > { %p1465_p1 = pnand %p1463_p11, %p2475_p10 }
  0x61   : > { %p1466_p6 = pneg %p1465_p1 }
  0x63   : > { %p1471_p12 = pnand %p1469_p8, %p1466_p6 }
  0x65   : > { %1474 = shalt.err (!%p1471_p12)
}
  0x66   : > { %s1475_s16 = scalar_lea.vmem %s249_s14, 512  ;;  %p2476_p5 = pmov %p2475_p10 }
  0x67   : > { %p1476_p0 = scmp.ne.s32.totalorder %s249_s14, %s1475_s16  ;;  %p1483_p4 = scmp.lt.s32.totalorder %s249_s14, %s249_s14 }
  0x68   : > { %p1484_p3 = scmp.lt.s32.totalorder %s1475_s16, %s1475_s16 }
  0x69   : > { %p1478_p9 = pnand %p1476_p0, %p2476_p5 }
  0x6a   : > { %p1485_p7 = por %p1484_p3, %p1483_p4 }
  0x6b   : > { %p1479_p2 = pneg %p1478_p9 }
  0x6d   : > { %p1486_p10 = pnand %p1485_p7, %p1479_p2 }
  0x6f   : > { %1489 = shalt.err (!%p1486_p10)
}
  0x70   : > { %s2477_s3 = smov 8   ;;  %s2478_s17 = smov 128  }
  0x71   : > { %1317 = dma.hbm_to_vmem [thread:$0]  (!%p2474_p13), %s2439_s4, 512, %s249_s14, [#allocation9], %s2478_s17, %s2478_s17, %s2477_s3  }
  0x72   : > { %s1291_s8 = sshll.u32 %s1636_s22, 9  ;;  %s266_s6 = scalar_lea.vmem [#allocation2], %s1270_s10 }
  0x73   : > { %s1870_s12 = scalar_lea.hbm %s2435_s0, %s1291_s8  ;;  %s276_s29 = sshll.u32 %s266_s6, 4  ;;  %s277_s29 = int_to_ptr.vmem [resolvable:$true] %s276_s29 }
  0x74   : > { %s263_s16 = scalar_lea.sflag [#allocation3], %s1792_s11  ;;  %s1490_s23 = scalar_lea.hbm %s1870_s12, 512 }
  0x75   : > { %p1491_p3 = scmp.ne.s32.totalorder %s1870_s12, %s1490_s23  ;;  %p2479_p7 = scmp.ne.s32.totalorder %s2473_s13, 0 }
  0x76   : > { %s1495_s17 = scalar_lea.hbm %s2435_s0, 1024  ;;  %p1496_p13 = scmp.lt.u32.totalorder %s1870_s12, %s2435_s0 }
  0x77   : > { %p1493_p11 = pnand %p1491_p3, %p2479_p7  ;;  %p1497_p6 = scmp.lt.u32.totalorder %s1495_s17, %s1490_s23 }
  0x78   : > { %p1499_p12 = scmp.lt.u32.totalorder %s1490_s23, %s1870_s12 }
  0x79   : > { %p1494_p1 = pneg %p1493_p11  ;;  %p1498_p8 = por %p1497_p6, %p1496_p13 }
  0x7b   : > { %p1500_p0 = por %p1499_p12, %p1498_p8 }
  0x7d   : > { %p1501_p5 = pnand %p1500_p0, %p1494_p1 }
  0x7f   : > { %1504 = shalt.err (!%p1501_p5)
}
  0x80   : > { %s1505_s10 = scalar_lea.vmem %s277_s29, 512  ;;  %s1647_s8 = smov [#allocation2]  }
  0x81   : > { %p1506_p9 = scmp.ne.s32.totalorder %s277_s29, %s1505_s10  ;;  %s1510_s15 = sshll.u32 %s1647_s8, 4  ;;  %s1511_s15 = int_to_ptr.vmem [resolvable:$false] %s1510_s15 }
  0x82   : > { %s1512_s25 = scalar_lea.vmem %s1511_s15, 1024  ;;  %p1513_p10 = scmp.lt.s32.totalorder %s277_s29, %s1511_s15 }
  0x83   : > { %p1508_p2 = pnand %p1506_p9, %p2479_p7  ;;  %p1514_p3 = scmp.lt.s32.totalorder %s1512_s25, %s1505_s10 }
  0x85   : > { %p1509_p4 = pneg %p1508_p2  ;;  %p1515_p11 = por %p1514_p3, %p1513_p10 }
  0x87   : > { %p1516_p6 = pnand %p1515_p11, %p1509_p4 }
  0x89   : > { %1519 = shalt.err (!%p1516_p6)
}
  0x8a   : > { %p2480_p13 = scmp.ne.s32.totalorder %s2470_s30, 0  ;;  %s1293_s23 = sshll.u32 %s1636_s22, 12 }
  0x8b   : > { %s2481_s6 = sshll.u32 %s1792_s11, 8  ;;  %s1896_s20 = scalar_lea.hbm %s2437_s2, %s1293_s23 }
  0x8c   : > { %1321 = dma.hbm_to_vmem [thread:$0]  (!%p2480_p13), %s1870_s12, 512, %s277_s29, %s263_s16  }
  0x8d   : > { %s308_s14 = scalar_lea.vmem [#allocation7], %s2481_s6  ;;  %s1520_s10 = scalar_lea.hbm %s1896_s20, 4096 }
  0x8e   : > { %s320_s3 = sshll.u32 %s308_s14, 4  ;;  %p1521_p1 = scmp.ne.s32.totalorder %s1896_s20, %s1520_s10  ;;  %s1898_s3 = int_to_ptr.vmem [resolvable:$true] %s320_s3 }
  0x8f   : > { %s1525_s29 = scalar_lea.hbm %s2437_s2, 8192  ;;  %p1526_p0 = scmp.lt.u32.totalorder %s1896_s20, %s2437_s2 }
  0x90   : > { %p1523_p8 = pnand %p1521_p1, %p2479_p7  ;;  %p1527_p5 = scmp.lt.u32.totalorder %s1525_s29, %s1520_s10 }
  0x91   : > { %p1529_p2 = scmp.lt.u32.totalorder %s1520_s10, %s1896_s20 }
  0x92   : > { %p1524_p12 = pneg %p1523_p8  ;;  %p1528_p9 = por %p1527_p5, %p1526_p0 }
  0x94   : > { %p1530_p4 = por %p1529_p2, %p1528_p9 }
  0x96   : > { %p1531_p10 = pnand %p1530_p4, %p1524_p12 }
  0x98   : > { %1534 = shalt.err (!%p1531_p10)
}
  0x99   : > { %s1535_s15 = scalar_lea.vmem %s1898_s3, 4096  ;;  %s1648_s25 = smov [#allocation7]  }
  0x9a   : > { %p1536_p3 = scmp.ne.s32.totalorder %s1898_s3, %s1535_s15  ;;  %s1540_s23 = sshll.u32 %s1648_s25, 4  ;;  %s1541_s23 = int_to_ptr.vmem [resolvable:$false] %s1540_s23 }
  0x9b   : > { %s1542_s6 = scalar_lea.vmem %s1541_s23, 8192  ;;  %p1543_p1 = scmp.lt.s32.totalorder %s1898_s3, %s1541_s23 }
  0x9c   : > { %p1538_p11 = pnand %p1536_p3, %p2479_p7  ;;  %p1544_p8 = scmp.lt.s32.totalorder %s1542_s6, %s1535_s15 }
  0x9e   : > { %p1539_p6 = pneg %p1538_p11  ;;  %p1545_p0 = por %p1544_p8, %p1543_p1 }
  0xa0   : > { %p1546_p5 = pnand %p1545_p0, %p1539_p6 }
  0xa2   : > { %1549 = shalt.err (!%p1546_p5)
}
  0xa3   : > { %s1649_s14 = smov 1024   ;;  %s1650_s17 = smov 64  }
  0xa4   : > { %1327 = dma.hbm_to_vmem [thread:$0]  (!%p2480_p13), %s1896_s20, 4096, %s1898_s3, %s1812_s7, %s1649_s14, %s1649_s14, %s1650_s17  }
  0xa5   : > { %p2482_p7 = scmp.ne.s32.totalorder %s2464_s28, 0 }
  0xa7   : > { %332 = sbr.rel (%p2482_p7) target bundleno = 402 (0x192), region = 40 }
  0xae   : > { %s1925_s13 = sand.u32 1, %s1624_s19   ;;  %p2483_p12 = scmp.ne.s32.totalorder %s2462_s26, 0 }
  0xaf   : > { %s1280_s1 = sshll.u32 %s1925_s13, 5  ;;  %s335_s10 = scalar_lea.sflag [#allocation3], %s1925_s13 }
  0xb0   : > { %s1929_s12 = scalar_lea.vmem [#allocation2], %s1280_s1 }
  0xb1   : > { %1603 = dma.done.wait (%p2483_p12), %s335_s10, 512  }
  0xb2   : > { %1605 = vsyncadd (%p2483_p12), %s335_s10, 4294966784  ;;  %s343_s28 = sand.u32 1, %s1718_s24   ;;  %s1281_s7 = sshll.u32 %s1925_s13, 3 }
  0xb3   : > { %s344_s30 = scalar_lea.sflag [#allocation6], %s343_s28  ;;  %s1937_s3 = scalar_lea.vmem [#allocation5], %s1281_s7 }
  0xb4   : > { %1607 = dma.done.wait (%p2483_p12), %s344_s30, 4224  }
  0xb5   : > { %1609 = vsyncadd (%p2483_p12), %s344_s30, 4294963072  ;;  %s1282_s20 = sshll.u32 %s1925_s13, 8  ;;  %p2484_p13 = scmp.eq.s32.totalorder %s1718_s24, 0 }
  0xb6   : > { %s1946_s11 = scalar_lea.vmem [#allocation7], %s1282_s20 }
  0xb7   : > { %1611 = dma.done.wait (%p2484_p13), [#allocation9], 1024   ;;  %p2485_p9 = pmov %p2484_p13 }
  0xb8   : > { %v1651_v0 = vmov 1   ;;  %v1652_v1 = vmov 0   ;;  %v461_v2 = vld [vmem:[#allocation8 + $0x10] sm:$0xff]  ;;  %v459_v3 = vld [vmem:[#allocation8] sm:$0xff]  ;;  %v462_v4 = vld [vmem:[#allocation8 + $0x18] sm:$0xff]  ;;  %v1653_v6 = vmov 2   ;;  %v415_v11 = vlaneseq }
  0xb9   : > { %1613 = vsyncadd (%p2485_p9), [#allocation9], 4294966272  ;;  %1398 = vset.pattern.permute.xlu0 %v1651_v0  ;;  %1397 = vset.pattern.permute.xlu1 %v1652_v1  ;;  %v460_v5 = vld [vmem:[#allocation8 + $0x8] sm:$0xff]  ;;  %v895_v7 = vld [vmem:[#allocation10] sm:$0xff]  ;;  %s2253_s24 = scalar_lea.vmem [#allocation11], %s1282_s20  ;;  %s1294_s26 = sshll.u32 %s1632_s21, 12 }
  0xba   : > { %475 = vperm.xlu1 %1397, %v461_v2   ;;  %592 = vperm.xlu0 %1398, %v459_v3   ;;  %v898_v8 = vld [vmem:[#allocation10 + $0x18] sm:$0xff]  ;;  %v896_v9 = vld [vmem:[#allocation10 + $0x8] sm:$0xff]  ;;  %v897_v10 = vld [vmem:[#allocation10 + $0x10] sm:$0xff]  ;;  %v416_v12 = vshrl.u32 %v415_v11, 7  ;;  %s1098_s29 = sshll.u32 %s2253_s24, 4  ;;  %s2376_s8 = scalar_lea.hbm %s2440_s5, %s1294_s26  ;;  %s2378_s29 = int_to_ptr.vmem [resolvable:$true] %s1098_s29 }
  0xbb   : > { %v413_v21 = vld [vmem:[%s1937_s3] sm:$0xff]  ;;  %v411_v36 = vld [vmem:[%s1929_s12 + $0x10] sm:$0x77]  ;;  %v412_v37 = vld [vmem:[%s1929_s12 + $0x18] sm:$0x77]  ;;  %s1080_s15 = scalar_lea.sflag [#allocation4], %s1925_s13 }
  0xbc   : > { %v417_v13 = vsub.s32 0, %v416_v12  ;;  %v1952_v14 = vsub.s32 1, %v416_v12  ;;  %v1954_v15 = vsub.s32 2, %v416_v12  ;;  %v429_v16 = vsub.s32 3, %v416_v12  ;;  %v409_v32 = vld [vmem:[%s1929_s12] sm:$0x77] }
  0xbd   : > { %v433_v17 = vsub.s32 4, %v416_v12  ;;  %v1956_v18 = vsub.s32 5, %v416_v12  ;;  %v1958_v19 = vsub.s32 6, %v416_v12  ;;  %v445_v20 = vsub.s32 7, %v416_v12  ;;  %v410_v33 = vld [vmem:[%s1929_s12 + $0x8] sm:$0x77] }
  0xbe   : > { %480 = vperm.xlu1 %1397, %v462_v4   ;;  %604 = vperm.xlu0 %1398, %v462_v4   ;;  %v418_v22 = vrot.slane %v413_v21, %v417_v13  ;;  %v422_v23 = vrot.slane %v413_v21, %v1952_v14  ;;  %v426_v24 = vrot.slane %v413_v21, %v1954_v15  ;;  %s1550_s25 = scalar_lea.vmem %s2378_s29, 4096  ;;  %p2534_p4 = scmp.ne.s32.totalorder %s2469_s9, 0 }
  0xbf   : > { %v430_v25 = vrot.slane %v413_v21, %v429_v16  ;;  %v434_v26 = vrot.slane %v413_v21, %v433_v17  ;;  %v438_v27 = vrot.slane %v413_v21, %v1956_v18  ;;  %v442_v28 = vrot.slane %v413_v21, %v1958_v19  ;;  %p1551_p2 = scmp.ne.s32.totalorder %s2378_s29, %s1550_s25  ;;  %s1654_s23 = smov [#allocation11]  }
  0xc0   : > { %v446_v29 = vrot.slane %v413_v21, %v445_v20  ;;  %v447_v30 = vcombine.low %v418_v22, %v422_v23  ;;  %s1554_s6 = sshll.u32 %s1654_s23, 4  ;;  %s1555_s6 = int_to_ptr.vmem [resolvable:$false] %s1554_s6 }
  0xc1   : > { %v448_v31 = vcombine.low %v426_v24, %v430_v25  ;;  %v449_v34 = vcombine.low %v434_v26, %v438_v27  ;;  %p1552_p10 = pnand %p1551_p2, %p2534_p4  ;;  %s1556_s14 = scalar_lea.vmem %s1555_s6, 8192 }
  0xc2   : > { %1399 = vset.pattern.permute.xlu1 %v1651_v0  ;;  %1401 = vset.pattern.permute.xlu0 %v1653_v6  ;;  %v450_v35 = vcombine.low %v442_v28, %v446_v29  ;;  %v455_v38 = vmul.f32 %v447_v30, %v409_v32  ;;  %p1557_p11 = scmp.lt.s32.totalorder %s2378_s29, %s1555_s6  ;;  %p1558_p6 = scmp.lt.s32.totalorder %s1556_s14, %s1550_s25 }
  0xc3   : > { %596 = vperm.xlu1 %1399, %v460_v5   ;;  %748 = vperm.xlu0 %1401, %v460_v5   ;;  %v456_v39 = vmul.f32 %v448_v31, %v410_v33  ;;  %v457_v40 = vmul.f32 %v449_v34, %v411_v36  ;;  %p1553_p3 = pneg %p1552_p10 }
  0xc4   : > { %v458_v41 = vmul.f32 %v450_v35, %v412_v37  ;;  %v490_v42 = vrot.slane %v455_v38, %v417_v13  ;;  %v494_v43 = vrot.slane %v455_v38, %v433_v17  ;;  %v610_v53 = vrot.slane %v455_v38, %v1952_v14  ;;  %p1559_p1 = por %p1558_p6, %p1557_p11 }
  0xc5   : > { %v498_v44 = vrot.slane %v456_v39, %v417_v13  ;;  %v502_v45 = vrot.slane %v456_v39, %v433_v17  ;;  %v506_v46 = vrot.slane %v457_v40, %v417_v13  ;;  %v510_v47 = vrot.slane %v457_v40, %v433_v17 }
  0xc6   : > { %v514_v48 = vrot.slane %v458_v41, %v417_v13  ;;  %v518_v49 = vrot.slane %v458_v41, %v433_v17  ;;  %v1969_v50 = vrot.slane %v490_v42, %v417_v13  ;;  %v1971_v51 = vrot.slane %v494_v43, %v417_v13  ;;  %p1560_p8 = pnand %p1559_p1, %p1553_p3 }
  0xc7   : > { %600 = vperm.xlu1 %1399, %v461_v2   ;;  %1402 = vset.pattern.permute.xlu0 %v1652_v1  ;;  %v1973_v52 = vrot.slane %v498_v44, %v417_v13  ;;  %v1976_v54 = vrot.slane %v502_v45, %v417_v13  ;;  %v1978_v55 = vrot.slane %v506_v46, %v417_v13 }
  0xc8   : > { %465 = vperm.xlu0 %1402, %v459_v3   ;;  %v1980_v56 = vrot.slane %v510_v47, %v417_v13  ;;  %v1982_v57 = vrot.slane %v514_v48, %v417_v13  ;;  %v1984_v58 = vrot.slane %v518_v49, %v417_v13  ;;  %v614_v59 = vrot.slane %v455_v38, %v1956_v18 }
  0xc9   : > { %v618_v60 = vrot.slane %v456_v39, %v1952_v14  ;;  %v622_v61 = vrot.slane %v456_v39, %v1956_v18  ;;  %v626_v62 = vrot.slane %v457_v40, %v1952_v14  ;;  %v630_v63 = vrot.slane %v457_v40, %v1956_v18 }
  0xca   : > { %v634_v0 = vrot.slane %v458_v41, %v1952_v14  ;;  %v2005_v11 = vrot.slane %v614_v59, %v1952_v14 }
  0xcb   : > { %1400 = vset.pattern.permute.xlu1 %v1653_v6  ;;  %v778_v6 = vrot.slane %v457_v40, %v1954_v15  ;;  %v2008_v12 = vrot.slane %v618_v60, %v1952_v14  ;;  %v2011_v13 = vrot.slane %v622_v61, %v1952_v14  ;;  %v2014_v16 = vrot.slane %v626_v62, %v1952_v14 }
  0xcc   : > { %744 = vperm.xlu1 %1400, %v459_v3   ;;  %470 = vperm.xlu0 %1402, %v460_v5   ;;  %v766_v3 = vrot.slane %v455_v38, %v1958_v19  ;;  %v774_v5 = vrot.slane %v456_v39, %v1958_v19  ;;  %v2017_v17 = vrot.slane %v630_v63, %v1952_v14 }
  0xcd   : > { %v2038_v26 = vrot.slane %v778_v6, %v1954_v15 }
  0xce   : > { %v2029_v21 = vrot.slane %v766_v3, %v1954_v15  ;;  %v2035_v23 = vrot.slane %v774_v5, %v1954_v15 }
  0xd0   : > { %752 = vperm.xlu1 %1400, %v461_v2   ;;  %901 = vperm.xlu0 %1402, %v895_v7   ;;  %v762_v2 = vrot.slane %v455_v38, %v1954_v15  ;;  %v782_v7 = vrot.slane %v457_v40, %v1958_v19 }
  0xd2   : > { %v2026_v20 = vrot.slane %v762_v2, %v1954_v15 }
  0xd4   : > { %756 = vperm.xlu1 %1400, %v462_v4   ;;  %916 = vperm.xlu0 %1402, %v898_v8   ;;  %v770_v4 = vrot.slane %v456_v39, %v1954_v15  ;;  %v786_v8 = vrot.slane %v458_v41, %v1954_v15 }
  0xd6   : > { %v2032_v22 = vrot.slane %v770_v4, %v1954_v15  ;;  %v2044_v27 = vrot.slane %v786_v8, %v1954_v15 }
  0xd8   : > { %1403 = vset.pattern.permute.xlu1 %v1652_v1  ;;  %v638_v1 = vrot.slane %v458_v41, %v1956_v18  ;;  %v2020_v18 = vrot.slane %v634_v0, %v1952_v14 }
  0xd9   : > { %906 = vperm.xlu1 %1403, %v896_v9   ;;  %v790_v9 = vrot.slane %v458_v41, %v1958_v19 }
  0xda   : > { %v2023_v19 = vrot.slane %v638_v1, %v1952_v14 }
  0xdb   : > { %v2047_v28 = vrot.slane %v790_v9, %v1954_v15 }
  0xdd   : > { %911 = vperm.xlu1 %1403, %v897_v10   ;;  %v2002_v10 = vrot.slane %v610_v53, %v1952_v14  ;;  %v2041_v14 = vrot.slane %v782_v7, %v1954_v15 }
 0x139   : > { %v476_v24 = vpop.permute.xlu1 %475  ;;  %v593_v25 = vpop.permute.xlu0 %592 }
 0x13a   : > { %v2050_v29 = vmul.f32 %v1969_v50, %v476_v24  ;;  %v2053_v30 = vmul.f32 %v1971_v51, %v476_v24  ;;  %v2056_v31 = vmul.f32 %v1973_v52, %v476_v24  ;;  %v2059_v32 = vmul.f32 %v1976_v54, %v476_v24 }
 0x13b   : > { %v2062_v33 = vmul.f32 %v1978_v55, %v476_v24  ;;  %v2065_v34 = vmul.f32 %v1980_v56, %v476_v24  ;;  %v2068_v15 = vmul.f32 %v1982_v57, %v476_v24  ;;  %v2071_v35 = vmul.f32 %v1984_v58, %v476_v24 }
 0x13c   : > { %2486 = vst [vmem:[#allocation20_spill] sm:$0xff] %v2050_v29  ;;  %2487 = vst [vmem:[#allocation21_spill] sm:$0xff] %v2053_v30  ;;  %v2074_v36 = vmul.f32 %v2002_v10, %v593_v25  ;;  %v2077_v37 = vmul.f32 %v2005_v11, %v593_v25  ;;  %v2080_v38 = vmul.f32 %v2008_v12, %v593_v25 }
 0x13d   : > { %2488 = vst [vmem:[#allocation22_spill] sm:$0xff] %v2056_v31  ;;  %2489 = vst [vmem:[#allocation23_spill] sm:$0xff] %v2059_v32  ;;  %v2083_v39 = vmul.f32 %v2011_v13, %v593_v25  ;;  %v2086_v40 = vmul.f32 %v2014_v16, %v593_v25  ;;  %v2089_v41 = vmul.f32 %v2017_v17, %v593_v25  ;;  %v481_v44 = vpop.permute.xlu1 %480  ;;  %v605_v45 = vpop.permute.xlu0 %604 }
 0x13e   : > { %2490 = vst [vmem:[#allocation24_spill] sm:$0xff] %v2062_v33  ;;  %2491 = vst [vmem:[#allocation25_spill] sm:$0xff] %v2065_v34  ;;  %v2092_v42 = vmul.f32 %v2020_v18, %v593_v25  ;;  %v2095_v43 = vmul.f32 %v2023_v19, %v593_v25  ;;  %v583_v46 = vmul.f32 %v1969_v50, %v481_v44 }
 0x13f   : > { %2492 = vst [vmem:[#allocation26_spill] sm:$0xff] %v2068_v15  ;;  %2493 = vst [vmem:[#allocation27_spill] sm:$0xff] %v2071_v35  ;;  %v584_v47 = vmul.f32 %v1971_v51, %v481_v44  ;;  %v585_v48 = vmul.f32 %v1973_v52, %v481_v44  ;;  %v586_v49 = vmul.f32 %v1976_v54, %v481_v44 }
 0x140   : > { %v2102_v53 = vmul.f32 %v1978_v55, %v481_v44  ;;  %v2105_v59 = vmul.f32 %v1980_v56, %v481_v44  ;;  %v2108_v60 = vmul.f32 %v1982_v57, %v481_v44  ;;  %v2111_v61 = vmul.f32 %v1984_v58, %v481_v44 }
 0x141   : > { %v703_v62 = vmul.f32 %v2002_v10, %v605_v45  ;;  %v704_v63 = vmul.f32 %v2005_v11, %v605_v45  ;;  %v705_v0 = vmul.f32 %v2008_v12, %v605_v45  ;;  %v706_v1 = vmul.f32 %v2011_v13, %v605_v45 }
 0x142   : > { %v2118_v2 = vmul.f32 %v2014_v16, %v605_v45  ;;  %v2121_v3 = vmul.f32 %v2017_v17, %v605_v45  ;;  %v2124_v4 = vmul.f32 %v2020_v18, %v605_v45  ;;  %v2127_v5 = vmul.f32 %v2023_v19, %v605_v45  ;;  %v597_v6 = vpop.permute.xlu1 %596  ;;  %v749_v7 = vpop.permute.xlu0 %748 }
 0x143   : > { %v2129_v8 = vadd.f32 %v703_v62, %v583_v46  ;;  %v2131_v9 = vadd.f32 %v704_v63, %v584_v47  ;;  %v2133_v24 = vadd.f32 %v705_v0, %v585_v48  ;;  %v2135_v25 = vadd.f32 %v706_v1, %v586_v49 }
 0x144   : > { %v687_v44 = vmul.f32 %v2002_v10, %v597_v6  ;;  %v688_v35 = vmul.f32 %v2005_v11, %v597_v6  ;;  %v689_v15 = vmul.f32 %v2008_v12, %v597_v6  ;;  %v690_v34 = vmul.f32 %v2011_v13, %v597_v6 }
 0x145   : > { %v691_v45 = vmul.f32 %v2014_v16, %v597_v6  ;;  %v692_v33 = vmul.f32 %v2017_v17, %v597_v6  ;;  %v693_v46 = vmul.f32 %v2020_v18, %v597_v6  ;;  %v694_v47 = vmul.f32 %v2023_v19, %v597_v6 }
 0x146   : > { %v2146_v48 = vmul.f32 %v2026_v20, %v749_v7  ;;  %v2149_v49 = vmul.f32 %v2029_v21, %v749_v7  ;;  %v2152_v62 = vmul.f32 %v2032_v22, %v749_v7  ;;  %v2155_v63 = vmul.f32 %v2035_v23, %v749_v7  ;;  %v601_v31 = vpop.permute.xlu1 %600 }
 0x147   : > { %v2158_v0 = vmul.f32 %v2038_v26, %v749_v7  ;;  %v2161_v1 = vmul.f32 %v2041_v14, %v749_v7  ;;  %v2164_v6 = vmul.f32 %v2044_v27, %v749_v7  ;;  %v2167_v32 = vmul.f32 %v2047_v28, %v749_v7 }
 0x148   : > { %2494 = vst [vmem:[#allocation28_spill] sm:$0xff] %v2146_v48  ;;  %2495 = vst [vmem:[#allocation29_spill] sm:$0xff] %v2149_v49  ;;  %v2170_v30 = vmul.f32 %v2002_v10, %v601_v31  ;;  %v2173_v29 = vmul.f32 %v2005_v11, %v601_v31  ;;  %v2185_v7 = vmul.f32 %v2017_v17, %v601_v31 }
 0x149   : > { %2496 = vst [vmem:[#allocation30_spill] sm:$0xff] %v2152_v62  ;;  %2497 = vst [vmem:[#allocation31_spill] sm:$0xff] %v2155_v63  ;;  %v2176_v63 = vmul.f32 %v2008_v12, %v601_v31  ;;  %v2182_v62 = vmul.f32 %v2014_v16, %v601_v31  ;;  %v2191_v10 = vmul.f32 %v2023_v19, %v601_v31 }
 0x14a   : > { %2498 = vst [vmem:[#allocation32_spill] sm:$0xff] %v2158_v0  ;;  %2499 = vst [vmem:[#allocation33_spill] sm:$0xff] %v2161_v1  ;;  %v2179_v0 = vmul.f32 %v2011_v13, %v601_v31  ;;  %v466_v1 = vpop.permute.xlu0 %465 }
 0x14b   : > { %2500 = vst [vmem:[#allocation34_spill] sm:$0xff] %v2164_v6  ;;  %2501 = vst [vmem:[#allocation35_spill] sm:$0xff] %v2167_v32  ;;  %v2188_v32 = vmul.f32 %v2020_v18, %v601_v31  ;;  %v559_v11 = vmul.f32 %v1969_v50, %v466_v1  ;;  %v560_v12 = vmul.f32 %v1971_v51, %v466_v1 }
 0x14c   : > { %2502 = vst [vmem:[#allocation36_spill] sm:$0xff] %v2170_v30  ;;  %2503 = vst [vmem:[#allocation37_spill] sm:$0xff] %v2173_v29  ;;  %v561_v13 = vmul.f32 %v1973_v52, %v466_v1  ;;  %v563_v16 = vmul.f32 %v1978_v55, %v466_v1  ;;  %v565_v17 = vmul.f32 %v1982_v57, %v466_v1 }
 0x14d   : > { %2504 = vst [vmem:[#allocation38_spill] sm:$0xff] %v2176_v63  ;;  %2505 = vst [vmem:[#allocation39_spill] sm:$0xff] %v2179_v0  ;;  %v562_v0 = vmul.f32 %v1976_v54, %v466_v1  ;;  %v566_v18 = vmul.f32 %v1984_v58, %v466_v1  ;;  %v712_v19 = vadd.f32 %v2077_v37, %v560_v12 }
 0x14e   : > { %2506 = vst [vmem:[#allocation40_spill] sm:$0xff] %v2182_v62  ;;  %2507 = vst [vmem:[#allocation41_spill] sm:$0xff] %v2185_v7  ;;  %v564_v62 = vmul.f32 %v1980_v56, %v466_v1  ;;  %v713_v31 = vadd.f32 %v2080_v38, %v561_v13  ;;  %v745_v7 = vpop.permute.xlu1 %744  ;;  %v715_v63 = vadd.f32 %v2086_v40, %v563_v16  ;;  %v471_v49 = vpop.permute.xlu0 %470 }
 0x14f   : > { %2508 = vst [vmem:[#allocation42_spill] sm:$0xff] %v2188_v32  ;;  %2509 = vst [vmem:[#allocation43_spill] sm:$0xff] %v2191_v10  ;;  %v711_v32 = vadd.f32 %v2074_v36, %v559_v11  ;;  %v714_v10 = vadd.f32 %v2083_v39, %v562_v0  ;;  %v717_v30 = vadd.f32 %v2092_v42, %v565_v17 }
 0x150   : > { %v716_v29 = vadd.f32 %v2089_v41, %v564_v62  ;;  %v718_v6 = vadd.f32 %v2095_v43, %v566_v18  ;;  %v831_v1 = vmul.f32 %v2026_v20, %v745_v7  ;;  %v832_v36 = vmul.f32 %v2029_v21, %v745_v7 }
 0x151   : > { %v833_v37 = vmul.f32 %v2032_v22, %v745_v7  ;;  %v834_v38 = vmul.f32 %v2035_v23, %v745_v7  ;;  %v835_v39 = vmul.f32 %v2038_v26, %v745_v7  ;;  %v836_v0 = vmul.f32 %v2041_v14, %v745_v7 }
 0x152   : > { %v837_v40 = vmul.f32 %v2044_v27, %v745_v7  ;;  %v838_v41 = vmul.f32 %v2047_v28, %v745_v7  ;;  %v567_v42 = vmul.f32 %v1969_v50, %v471_v49  ;;  %v568_v43 = vmul.f32 %v1971_v51, %v471_v49 }
 0x153   : > { %v569_v62 = vmul.f32 %v1973_v52, %v471_v49  ;;  %v570_v11 = vmul.f32 %v1976_v54, %v471_v49  ;;  %v571_v12 = vmul.f32 %v1978_v55, %v471_v49  ;;  %v572_v13 = vmul.f32 %v1980_v56, %v471_v49  ;;  %v902_v56 = vpop.permute.xlu0 %901 }
 0x154   : > { %v573_v16 = vmul.f32 %v1982_v57, %v471_v49  ;;  %v574_v17 = vmul.f32 %v1984_v58, %v471_v49  ;;  %v2225_v18 = vadd.f32 %v687_v44, %v567_v42  ;;  %v2227_v48 = vadd.f32 %v688_v35, %v568_v43  ;;  %v2241_v57 = vpop.permute.xlu1 %752  ;;  %v984_v42 = vld [vmem:[%s1946_s11 + $0x8] sm:$0xff] }
 0x155   : > { %v2229_v7 = vadd.f32 %v689_v15, %v569_v62  ;;  %v2231_v50 = vadd.f32 %v690_v34, %v570_v11  ;;  %v2233_v51 = vadd.f32 %v691_v45, %v571_v12  ;;  %v2235_v52 = vadd.f32 %v692_v33, %v572_v13  ;;  %v986_v13 = vld [vmem:[%s1946_s11 + $0x18] sm:$0xff] }
 0x156   : > { %v2237_v54 = vadd.f32 %v693_v46, %v573_v16  ;;  %v2239_v55 = vadd.f32 %v694_v47, %v574_v17  ;;  %v863_v58 = vadd.f32 %v831_v1, %v711_v32  ;;  %v864_v15 = vadd.f32 %v832_v36, %v712_v19  ;;  %v983_v46 = vld [vmem:[%s1946_s11] sm:$0xff]  ;;  %v985_v47 = vld [vmem:[%s1946_s11 + $0x10] sm:$0xff]  ;;  %v988_v1 = vld [vmem:[%s1946_s11 + $0x28] sm:$0xff] }
 0x157   : > { %v865_v34 = vadd.f32 %v833_v37, %v713_v31  ;;  %v866_v35 = vadd.f32 %v834_v38, %v714_v10  ;;  %v867_v44 = vadd.f32 %v835_v39, %v715_v63  ;;  %v868_v45 = vadd.f32 %v836_v0, %v716_v29  ;;  %v987_v32 = vld [vmem:[%s1946_s11 + $0x20] sm:$0xff]  ;;  %v989_v63 = vld [vmem:[%s1946_s11 + $0x30] sm:$0xff]  ;;  %v990_v29 = vld [vmem:[%s1946_s11 + $0x38] sm:$0xff] }
 0x158   : > { %v869_v49 = vadd.f32 %v837_v40, %v717_v30  ;;  %v870_v33 = vadd.f32 %v838_v41, %v718_v6  ;;  %v919_v43 = vadd.f32 %v902_v56, %v863_v58  ;;  %v920_v62 = vadd.f32 %v902_v56, %v864_v15 }
 0x159   : > { %v921_v11 = vadd.f32 %v902_v56, %v865_v34  ;;  %v922_v12 = vadd.f32 %v902_v56, %v866_v35  ;;  %v923_v19 = vadd.f32 %v902_v56, %v867_v44  ;;  %v924_v36 = vadd.f32 %v902_v56, %v868_v45  ;;  %v757_v34 = vpop.permute.xlu1 %756 }
 0x15a   : > { %v925_v31 = vadd.f32 %v902_v56, %v869_v49  ;;  %v926_v10 = vadd.f32 %v902_v56, %v870_v33  ;;  %v951_v30 = vmax.f32 %v919_v43, 0.0  ;;  %v952_v37 = vmax.f32 %v920_v62, 0.0 }
 0x15b   : > { %v953_v6 = vmax.f32 %v921_v11, 0.0  ;;  %v954_v38 = vmax.f32 %v922_v12, 0.0  ;;  %v955_v39 = vmax.f32 %v923_v19, 0.0  ;;  %v956_v0 = vmax.f32 %v924_v36, 0.0  ;;  %v917_v12 = vpop.permute.xlu0 %916  ;;  %v1007_v36 = vld [vmem:[%s1946_s11 + $0xc0] sm:$0xff] }
 0x15c   : > { %v957_v40 = vmax.f32 %v925_v31, 0.0  ;;  %v958_v41 = vmax.f32 %v926_v10, 0.0  ;;  %v1015_v16 = vadd.f32 %v983_v46, %v951_v30  ;;  %v1016_v17 = vadd.f32 %v984_v42, %v952_v37  ;;  %v1008_v31 = vld [vmem:[%s1946_s11 + $0xc8] sm:$0xff]  ;;  %v1009_v10 = vld [vmem:[%s1946_s11 + $0xd0] sm:$0xff]  ;;  %v1010_v30 = vld [vmem:[%s1946_s11 + $0xd8] sm:$0xff] }
 0x15d   : > { %v1017_v58 = vadd.f32 %v985_v47, %v953_v6  ;;  %v1018_v15 = vadd.f32 %v986_v13, %v954_v38  ;;  %v1019_v35 = vadd.f32 %v987_v32, %v955_v39  ;;  %v1020_v44 = vadd.f32 %v988_v1, %v956_v0  ;;  %v1011_v37 = vld [vmem:[%s1946_s11 + $0xe0] sm:$0xff]  ;;  %v1013_v0 = vld [vmem:[%s1946_s11 + $0xf0] sm:$0xff] }
 0x15e   : > { %v1021_v45 = vadd.f32 %v989_v63, %v957_v40  ;;  %v1022_v56 = vadd.f32 %v990_v29, %v958_v41  ;;  %1047 = vst [vmem:[%s2253_s24] sm:$0xff] %v1015_v16  ;;  %1048 = vst [vmem:[%s2253_s24 + $0x8] sm:$0xff] %v1016_v17  ;;  %v739_v49 = vadd.f32 %v2118_v2, %v2102_v53  ;;  %v1014_v40 = vld [vmem:[%s1946_s11 + $0xf8] sm:$0xff] }
 0x15f   : > { %1049 = vst [vmem:[%s2253_s24 + $0x10] sm:$0xff] %v1017_v58  ;;  %1050 = vst [vmem:[%s2253_s24 + $0x18] sm:$0xff] %v1018_v15  ;;  %v740_v33 = vadd.f32 %v2121_v3, %v2105_v59  ;;  %v741_v46 = vadd.f32 %v2124_v4, %v2108_v60  ;;  %v742_v42 = vadd.f32 %v2127_v5, %v2111_v61 }
 0x160   : > { %1051 = vst [vmem:[%s2253_s24 + $0x20] sm:$0xff] %v1019_v35  ;;  %1052 = vst [vmem:[%s2253_s24 + $0x28] sm:$0xff] %v1020_v44  ;;  %v855_v47 = vmul.f32 %v2026_v20, %v757_v34  ;;  %v856_v43 = vmul.f32 %v2029_v21, %v757_v34  ;;  %v857_v53 = vmul.f32 %v2032_v22, %v757_v34 }
 0x161   : > { %1053 = vst [vmem:[%s2253_s24 + $0x30] sm:$0xff] %v1021_v45  ;;  %1054 = vst [vmem:[%s2253_s24 + $0x38] sm:$0xff] %v1022_v56  ;;  %v858_v59 = vmul.f32 %v2035_v23, %v757_v34  ;;  %v859_v60 = vmul.f32 %v2038_v26, %v757_v34  ;;  %v860_v2 = vmul.f32 %v2041_v14, %v757_v34 }
 0x162   : > { %v861_v61 = vmul.f32 %v2044_v27, %v757_v34  ;;  %v862_v3 = vmul.f32 %v2047_v28, %v757_v34  ;;  %v887_v4 = vadd.f32 %v855_v47, %v2129_v8  ;;  %v888_v5 = vadd.f32 %v856_v43, %v2131_v9 }
 0x163   : > { %v889_v62 = vadd.f32 %v857_v53, %v2133_v24  ;;  %v890_v11 = vadd.f32 %v858_v59, %v2135_v25  ;;  %v891_v13 = vadd.f32 %v859_v60, %v739_v49  ;;  %v892_v32 = vadd.f32 %v860_v2, %v740_v33  ;;  %v1012_v24 = vld [vmem:[%s1946_s11 + $0xe8] sm:$0xff]  ;;  %v907_v53 = vpop.permute.xlu1 %906  ;;  %v2510_v59 = vld [vmem:[#allocation28_spill] sm:$0xff] }
 0x164   : > { %v893_v1 = vadd.f32 %v861_v61, %v741_v46  ;;  %v894_v19 = vadd.f32 %v862_v3, %v742_v42  ;;  %v943_v8 = vadd.f32 %v917_v12, %v887_v4  ;;  %v944_v63 = vadd.f32 %v917_v12, %v888_v5  ;;  %v2511_v2 = vld [vmem:[#allocation29_spill] sm:$0xff]  ;;  %v2512_v3 = vld [vmem:[#allocation30_spill] sm:$0xff]  ;;  %v2513_v5 = vld [vmem:[#allocation31_spill] sm:$0xff] }
 0x165   : > { %v945_v29 = vadd.f32 %v917_v12, %v889_v62  ;;  %v946_v9 = vadd.f32 %v917_v12, %v890_v11  ;;  %v947_v6 = vadd.f32 %v917_v12, %v891_v13  ;;  %v948_v38 = vadd.f32 %v917_v12, %v892_v32  ;;  %v2514_v11 = vld [vmem:[#allocation32_spill] sm:$0xff] }
 0x166   : > { %v949_v25 = vadd.f32 %v917_v12, %v893_v1  ;;  %v950_v39 = vadd.f32 %v917_v12, %v894_v19  ;;  %v975_v41 = vmax.f32 %v943_v8, 0.0  ;;  %v976_v16 = vmax.f32 %v944_v63, 0.0  ;;  %v991_v1 = vld [vmem:[%s1946_s11 + $0x40] sm:$0xff]  ;;  %v992_v19 = vld [vmem:[%s1946_s11 + $0x48] sm:$0xff] }
 0x167   : > { %v977_v17 = vmax.f32 %v945_v29, 0.0  ;;  %v978_v58 = vmax.f32 %v946_v9, 0.0  ;;  %v979_v15 = vmax.f32 %v947_v6, 0.0  ;;  %v980_v34 = vmax.f32 %v948_v38, 0.0  ;;  %v994_v29 = vld [vmem:[%s1946_s11 + $0x58] sm:$0xff]  ;;  %v996_v9 = vld [vmem:[%s1946_s11 + $0x68] sm:$0xff] }
 0x168   : > { %v981_v35 = vmax.f32 %v949_v25, 0.0  ;;  %v982_v44 = vmax.f32 %v950_v39, 0.0  ;;  %v1039_v45 = vadd.f32 %v1007_v36, %v975_v41  ;;  %v1040_v56 = vadd.f32 %v1008_v31, %v976_v16  ;;  %v993_v36 = vld [vmem:[%s1946_s11 + $0x50] sm:$0xff]  ;;  %v998_v6 = vld [vmem:[%s1946_s11 + $0x78] sm:$0xff] }
 0x169   : > { %v1041_v49 = vadd.f32 %v1009_v10, %v977_v17  ;;  %v1042_v33 = vadd.f32 %v1010_v30, %v978_v58  ;;  %v1043_v46 = vadd.f32 %v1011_v37, %v979_v15  ;;  %v1044_v42 = vadd.f32 %v1012_v24, %v980_v34 }
 0x16a   : > { %v1045_v47 = vadd.f32 %v1013_v0, %v981_v35  ;;  %v1046_v43 = vadd.f32 %v1014_v40, %v982_v44  ;;  %1071 = vst [vmem:[%s2253_s24 + $0xc0] sm:$0xff] %v1039_v45  ;;  %1072 = vst [vmem:[%s2253_s24 + $0xc8] sm:$0xff] %v1040_v56  ;;  %v871_v60 = vadd.f32 %v2510_v59, %v2225_v18  ;;  %v2515_v18 = vld [vmem:[#allocation33_spill] sm:$0xff]  ;;  %v2523_v59 = vld [vmem:[#allocation38_spill] sm:$0xff] }
 0x16b   : > { %1073 = vst [vmem:[%s2253_s24 + $0xd0] sm:$0xff] %v1041_v49  ;;  %1074 = vst [vmem:[%s2253_s24 + $0xd8] sm:$0xff] %v1042_v33  ;;  %v872_v61 = vadd.f32 %v2511_v2, %v2227_v48  ;;  %v873_v4 = vadd.f32 %v2512_v3, %v2229_v7  ;;  %v874_v62 = vadd.f32 %v2513_v5, %v2231_v50  ;;  %v2516_v48 = vld [vmem:[#allocation34_spill] sm:$0xff]  ;;  %v2517_v7 = vld [vmem:[#allocation35_spill] sm:$0xff] }
 0x16c   : > { %1075 = vst [vmem:[%s2253_s24 + $0xe0] sm:$0xff] %v1043_v46  ;;  %1076 = vst [vmem:[%s2253_s24 + $0xe8] sm:$0xff] %v1044_v42  ;;  %v875_v12 = vadd.f32 %v2514_v11, %v2233_v51  ;;  %v876_v13 = vadd.f32 %v2515_v18, %v2235_v52  ;;  %v877_v32 = vadd.f32 %v2516_v48, %v2237_v54  ;;  %v995_v51 = vld [vmem:[%s1946_s11 + $0x60] sm:$0xff]  ;;  %v997_v54 = vld [vmem:[%s1946_s11 + $0x70] sm:$0xff] }
 0x16d   : > { %1077 = vst [vmem:[%s2253_s24 + $0xf0] sm:$0xff] %v1045_v47  ;;  %1078 = vst [vmem:[%s2253_s24 + $0xf8] sm:$0xff] %v1046_v43  ;;  %v878_v50 = vadd.f32 %v2517_v7, %v2239_v55  ;;  %v927_v31 = vadd.f32 %v907_v53, %v871_v60  ;;  %v928_v10 = vadd.f32 %v907_v53, %v872_v61  ;;  %v2518_v49 = vld [vmem:[#allocation20_spill] sm:$0xff]  ;;  %v2520_v42 = vld [vmem:[#allocation21_spill] sm:$0xff] }
 0x16e   : > { %v929_v8 = vadd.f32 %v907_v53, %v873_v4  ;;  %v930_v63 = vadd.f32 %v907_v53, %v874_v62  ;;  %v931_v30 = vadd.f32 %v907_v53, %v875_v12  ;;  %v932_v52 = vadd.f32 %v907_v53, %v876_v13  ;;  %v2519_v33 = vld [vmem:[#allocation36_spill] sm:$0xff]  ;;  %v2521_v47 = vld [vmem:[#allocation37_spill] sm:$0xff]  ;;  %v2524_v2 = vld [vmem:[#allocation23_spill] sm:$0xff] }
 0x16f   : > { %v933_v37 = vadd.f32 %v907_v53, %v877_v32  ;;  %v934_v24 = vadd.f32 %v907_v53, %v878_v50  ;;  %v959_v38 = vmax.f32 %v927_v31, 0.0  ;;  %v960_v55 = vmax.f32 %v928_v10, 0.0  ;;  %v2522_v53 = vld [vmem:[#allocation22_spill] sm:$0xff]  ;;  %v2525_v61 = vld [vmem:[#allocation39_spill] sm:$0xff]  ;;  %v2526_v4 = vld [vmem:[#allocation24_spill] sm:$0xff] }
 0x170   : > { %v961_v25 = vmax.f32 %v929_v8, 0.0  ;;  %v962_v39 = vmax.f32 %v930_v63, 0.0  ;;  %v963_v0 = vmax.f32 %v931_v30, 0.0  ;;  %v964_v40 = vmax.f32 %v932_v52, 0.0  ;;  %v2527_v5 = vld [vmem:[#allocation40_spill] sm:$0xff]  ;;  %v2528_v11 = vld [vmem:[#allocation25_spill] sm:$0xff]  ;;  %v912_v8 = vpop.permute.xlu1 %911 }
 0x171   : > { %v965_v41 = vmax.f32 %v933_v37, 0.0  ;;  %v966_v16 = vmax.f32 %v934_v24, 0.0  ;;  %v1023_v17 = vadd.f32 %v991_v1, %v959_v38  ;;  %v1024_v58 = vadd.f32 %v992_v19, %v960_v55  ;;  %v2529_v12 = vld [vmem:[#allocation41_spill] sm:$0xff]  ;;  %v2530_v13 = vld [vmem:[#allocation26_spill] sm:$0xff]  ;;  %v2532_v7 = vld [vmem:[#allocation27_spill] sm:$0xff] }
 0x172   : > { %v1025_v15 = vadd.f32 %v993_v36, %v961_v25  ;;  %v1026_v34 = vadd.f32 %v994_v29, %v962_v39  ;;  %v1027_v35 = vadd.f32 %v995_v51, %v963_v0  ;;  %v1028_v44 = vadd.f32 %v996_v9, %v964_v40  ;;  %v2531_v48 = vld [vmem:[#allocation42_spill] sm:$0xff]  ;;  %v2533_v50 = vld [vmem:[#allocation43_spill] sm:$0xff]  ;;  %v1000_v24 = vld [vmem:[%s1946_s11 + $0x88] sm:$0xff] }
 0x173   : > { %v1029_v45 = vadd.f32 %v997_v54, %v965_v41  ;;  %v1030_v56 = vadd.f32 %v998_v6, %v966_v16  ;;  %1055 = vst [vmem:[%s2253_s24 + $0x40] sm:$0xff] %v1023_v17  ;;  %1056 = vst [vmem:[%s2253_s24 + $0x48] sm:$0xff] %v1024_v58  ;;  %v727_v46 = vadd.f32 %v2519_v33, %v2518_v49  ;;  %v1002_v38 = vld [vmem:[%s1946_s11 + $0x98] sm:$0xff]  ;;  %v1003_v55 = vld [vmem:[%s1946_s11 + $0xa0] sm:$0xff] }
 0x174   : > { %1057 = vst [vmem:[%s2253_s24 + $0x50] sm:$0xff] %v1025_v15  ;;  %1058 = vst [vmem:[%s2253_s24 + $0x58] sm:$0xff] %v1026_v34  ;;  %v728_v43 = vadd.f32 %v2521_v47, %v2520_v42  ;;  %v729_v60 = vadd.f32 %v2523_v59, %v2522_v53  ;;  %v730_v3 = vadd.f32 %v2525_v61, %v2524_v2  ;;  %v1004_v25 = vld [vmem:[%s1946_s11 + $0xa8] sm:$0xff]  ;;  %v1005_v16 = vld [vmem:[%s1946_s11 + $0xb0] sm:$0xff] }
 0x175   : > { %1059 = vst [vmem:[%s2253_s24 + $0x60] sm:$0xff] %v1027_v35  ;;  %1060 = vst [vmem:[%s2253_s24 + $0x68] sm:$0xff] %v1028_v44  ;;  %v731_v62 = vadd.f32 %v2527_v5, %v2526_v4  ;;  %v732_v18 = vadd.f32 %v2529_v12, %v2528_v11  ;;  %v733_v32 = vadd.f32 %v2531_v48, %v2530_v13  ;;  %v1006_v17 = vld [vmem:[%s1946_s11 + $0xb8] sm:$0xff] }
 0x176   : > { %1061 = vst [vmem:[%s2253_s24 + $0x70] sm:$0xff] %v1029_v45  ;;  %1062 = vst [vmem:[%s2253_s24 + $0x78] sm:$0xff] %v1030_v56  ;;  %v734_v1 = vadd.f32 %v2533_v50, %v2532_v7  ;;  %v847_v19 = vmul.f32 %v2026_v20, %v2241_v57  ;;  %v848_v36 = vmul.f32 %v2029_v21, %v2241_v57 }
 0x177   : > { %v849_v31 = vmul.f32 %v2032_v22, %v2241_v57  ;;  %v850_v10 = vmul.f32 %v2035_v23, %v2241_v57  ;;  %v851_v63 = vmul.f32 %v2038_v26, %v2241_v57  ;;  %v852_v29 = vmul.f32 %v2041_v14, %v2241_v57  ;;  %v999_v14 = vld [vmem:[%s1946_s11 + $0x80] sm:$0xff] }
 0x178   : > { %v853_v20 = vmul.f32 %v2044_v27, %v2241_v57  ;;  %v854_v21 = vmul.f32 %v2047_v28, %v2241_v57  ;;  %v879_v22 = vadd.f32 %v847_v19, %v727_v46  ;;  %v880_v51 = vadd.f32 %v848_v36, %v728_v43  ;;  %v1001_v27 = vld [vmem:[%s1946_s11 + $0x90] sm:$0xff] }
 0x179   : > { %v881_v23 = vadd.f32 %v849_v31, %v729_v60  ;;  %v882_v9 = vadd.f32 %v850_v10, %v730_v3  ;;  %v883_v30 = vadd.f32 %v851_v63, %v731_v62  ;;  %v884_v52 = vadd.f32 %v852_v29, %v732_v18 }
 0x17a   : > { %v885_v37 = vadd.f32 %v853_v20, %v733_v32  ;;  %v886_v26 = vadd.f32 %v854_v21, %v734_v1  ;;  %v935_v54 = vadd.f32 %v912_v8, %v879_v22  ;;  %v936_v28 = vadd.f32 %v912_v8, %v880_v51 }
 0x17b   : > { %v937_v57 = vadd.f32 %v912_v8, %v881_v23  ;;  %v938_v6 = vadd.f32 %v912_v8, %v882_v9  ;;  %v939_v39 = vadd.f32 %v912_v8, %v883_v30  ;;  %v940_v0 = vadd.f32 %v912_v8, %v884_v52 }
 0x17c   : > { %v941_v40 = vadd.f32 %v912_v8, %v885_v37  ;;  %v942_v41 = vadd.f32 %v912_v8, %v886_v26  ;;  %v967_v58 = vmax.f32 %v935_v54, 0.0  ;;  %v968_v15 = vmax.f32 %v936_v28, 0.0 }
 0x17d   : > { %v969_v34 = vmax.f32 %v937_v57, 0.0  ;;  %v970_v35 = vmax.f32 %v938_v6, 0.0  ;;  %v971_v44 = vmax.f32 %v939_v39, 0.0  ;;  %v972_v45 = vmax.f32 %v940_v0, 0.0 }
 0x17e   : > { %v973_v56 = vmax.f32 %v941_v40, 0.0  ;;  %v974_v49 = vmax.f32 %v942_v41, 0.0  ;;  %v1031_v33 = vadd.f32 %v999_v14, %v967_v58  ;;  %v1032_v46 = vadd.f32 %v1000_v24, %v968_v15 }
 0x17f   : > { %v1033_v42 = vadd.f32 %v1001_v27, %v969_v34  ;;  %v1034_v47 = vadd.f32 %v1002_v38, %v970_v35  ;;  %v1035_v43 = vadd.f32 %v1003_v55, %v971_v44  ;;  %v1036_v53 = vadd.f32 %v1004_v25, %v972_v45 }
 0x180   : > { %v1037_v59 = vadd.f32 %v1005_v16, %v973_v56  ;;  %v1038_v60 = vadd.f32 %v1006_v17, %v974_v49  ;;  %1063 = vst [vmem:[%s2253_s24 + $0x80] sm:$0xff] %v1031_v33  ;;  %1064 = vst [vmem:[%s2253_s24 + $0x88] sm:$0xff] %v1032_v46 }
 0x181   : > { %1065 = vst [vmem:[%s2253_s24 + $0x90] sm:$0xff] %v1033_v42  ;;  %1066 = vst [vmem:[%s2253_s24 + $0x98] sm:$0xff] %v1034_v47 }
 0x182   : > { %1067 = vst [vmem:[%s2253_s24 + $0xa0] sm:$0xff] %v1035_v43  ;;  %1068 = vst [vmem:[%s2253_s24 + $0xa8] sm:$0xff] %v1036_v53 }
 0x183   : > { %1069 = vst [vmem:[%s2253_s24 + $0xb0] sm:$0xff] %v1037_v59  ;;  %1070 = vst [vmem:[%s2253_s24 + $0xb8] sm:$0xff] %v1038_v60 }
 0x184   : > { %1563 = shalt.err (!%p1560_p8)
}
 0x185   : > { %s1564_s17 = scalar_lea.hbm %s2376_s8, 4096  ;;  %s1568_s12 = scalar_lea.hbm %s2440_s5, 8192 }
 0x186   : > { %p1565_p0 = scmp.ne.s32.totalorder %s2376_s8, %s1564_s17  ;;  %p1569_p12 = scmp.lt.u32.totalorder %s2376_s8, %s2440_s5 }
 0x187   : > { %p1570_p13 = scmp.lt.u32.totalorder %s1568_s12, %s1564_s17  ;;  %p1572_p2 = scmp.lt.u32.totalorder %s1564_s17, %s2376_s8 }
 0x188   : > { %p1566_p5 = pnand %p1565_p0, %p2534_p4 }
 0x189   : > { %p1571_p9 = por %p1570_p13, %p1569_p12 }
 0x18a   : > { %p1567_p7 = pneg %p1566_p5 }
 0x18b   : > { %p1573_p10 = por %p1572_p2, %p1571_p9 }
 0x18d   : > { %p1574_p3 = pnand %p1573_p10, %p1567_p7 }
 0x18f   : > { %1577 = shalt.err (!%p1574_p3)
}
 0x190   : > { %s1655_s30 = smov 1024   ;;  %s1656_s3 = smov 64  }
 0x191   : > { %1309 = dma.vmem_to_hbm [thread:$0]  (%p2534_p4), %s2378_s29, 4096, %s2376_s8, %s1080_s15, %s1655_s30, %s1655_s30, %s1656_s3  }
 0x192 PF: > { %s2535_s20 = sld [smem:[#allocation17_spill]]  ;;  %s1113_s11 = sand.u32 1, %s1620_s18  }
 0x193   : > { %p2536_p11 = scmp.ne.s32.totalorder %s2463_s27, 0  ;;  %s1114_s24 = scalar_lea.sflag [#allocation4], %s1113_s11 }
 0x198   : > { %p2537_p6 = scmp.ge.s32.totalorder %s2535_s20, 2 }
 0x19a   : > { %p1329_p1 = pnand %p2537_p6, %p2536_p11 }
 0x19c   : > { %1615 = dma.done.wait (!%p1329_p1), %s1114_s24, 4096  }
 0x19d   : > { %1617 = vsyncadd (!%p1329_p1), %s1114_s24, 4294963200  ;;  %s25_s23 = sadd.s32 1, %s2535_s20   ;;  %s2538_s26 = sld [smem:[#allocation16_spill]] }
 0x19e   : > { %p22_p8 = scmp.ge.s32.totalorder %s25_s23, 4   ;;  %s2539_s20 = sld [smem:[#allocation19_spill]] }
 0x19f   : > { %s2540_s9 = sld [smem:[#allocation18_spill]]  ;;  %s2541_s18 = smov %s1624_s19 }
 0x1a0   : > { %s2543_s21 = smov %s1636_s22  ;;  %24 = sbr.rel (!%p22_p8) target bundleno = 12 (0xc), region = 119 }
 0x1a3   : > { %s2542_s19 = smov %s2538_s26 }
 0x1a5   : > { %s2544_s22 = smov %s2540_s9 }
 0x1a7   :  { %1119 = vsyncpa [#allocation3], 1 }
 0x1a8   :  { %1121 = vsyncpa [#allocation3 + $0x1], 1 }
 0x1a9   :  { %1122 = vsyncpa [#allocation6], 1 }
 0x1aa   :  { %1124 = vsyncpa [#allocation6 + $0x1], 1 }
 0x1ab   :  { %1125 = vsyncpa [#allocation9], 1 }
 0x1ac   :  { %1126 = vsyncpa [#allocation4], 1 }
 0x1ad   :  { %1128 = vsyncpa [#allocation4 + $0x1], 1 }

</bundles_post_ra>
